<compile_context>
chip_gen: v7x
topology: tpu7x:2x2x1
jax: 0.10.0
libtpu: 0.0.40
codegen_flags: <defaults>
</compile_context>

<pallas_src>
import jax
import jax.numpy as jnp
from jax.experimental import pallas as pl
from jax.experimental.pallas import tpu as pltpu

_K = 5            # Conv1d kernel_size in Doubleconv_35
_LANES = 128
_VMEM_BUDGET = 40 * 1024 * 1024   # per-step working-set target (fits v7x's 64 MiB VMEM)


def _round_up(x, m):
    return (x + m - 1) // m * m


def _doubleconv_kernel(x_ref, w1_ref, b1_ref, w2_ref, b2_ref, o_ref,
                       xstack_ref, hstack_ref):
    # x_ref     : (bt, Cin, L)               input block, NCL (L on lanes)
    # w1_ref    : (K, Cout, Cin_pad)         per-tap matrices, zero-padded channel cols
    # b1_ref    : (Cout, 1)                  f32
    # w2_ref    : (K, Cout, Cout_pad)
    # b2_ref    : (Cout, 1)
    # o_ref     : (bt, Cout, L2p)            L2p = round_up(L-8, 128)  (tail sliced off)
    # xstack_ref: (Cin_pad,  bt*S + 128)     batch stacked along lanes, stride S
    # hstack_ref: (Cout_pad, bt*S + 128)     resident intermediate activation
    bt, cin, L = x_ref.shape
    cout, L2p = o_ref.shape[1], o_ref.shape[2]
    cin_pad = xstack_ref.shape[0]
    cout_pad = hstack_ref.shape[0]
    S = _round_up(L, _LANES)        # per-batch lane stride (multiple of 128)
    n_cols = bt * S                 # matmul width over the whole stacked batch block
    assert xstack_ref.shape[1] == n_cols + _LANES
    assert hstack_ref.shape[1] == n_cols + _LANES
    assert L2p <= S

    # Padded channel ROWS feed every matmul output column, so they must be zero (stale
    # VMEM could hold NaN/Inf).  They are never written afterwards, so zero them only on
    # the first grid step (scratch persists across grid iterations).
    if cin_pad > cin:
        @pl.when(pl.program_id(0) == 0)
        def _():
            xstack_ref[pl.ds(cin, cin_pad - cin), :] = jnp.zeros(
                (cin_pad - cin, xstack_ref.shape[1]), xstack_ref.dtype)
    if cout_pad > cout:
        @pl.when(pl.program_id(0) == 0)
        def _():
            hstack_ref[pl.ds(cout, cout_pad - cout), :] = jnp.zeros(
                (cout_pad - cout, hstack_ref.shape[1]), hstack_ref.dtype)

    # Stack the batch along lanes: each x element is written exactly once (no im2col
    # write amplification); lane offsets b*S are multiples of 128 (aligned stores).
    for b in range(bt):             # bt is small and static
        xstack_ref[pl.ds(0, cin), pl.ds(b * S, L)] = x_ref[b].astype(xstack_ref.dtype)

    # ---- Conv #1: K lane-shifted matmuls over the whole stacked block (one MXU issue
    # per tap).  Shifted operands are read straight from the resident ref. ----
    acc = jnp.dot(w1_ref[0], xstack_ref[:, pl.ds(0, n_cols)],
                  preferred_element_type=jnp.float32)
    for k in range(1, _K):
        acc += jnp.dot(w1_ref[k], xstack_ref[:, pl.ds(k, n_cols)],
                       preferred_element_type=jnp.float32)
    h = jnp.maximum(acc + b1_ref[...], 0.0)          # bias + ReLU in f32 (VPU), once
    # Intermediate activation written ONCE, full-lane-width aligned store.
    hstack_ref[pl.ds(0, cout), pl.ds(0, n_cols)] = h.astype(hstack_ref.dtype)

    # ---- Conv #2: identical structure on the resident intermediate (no copies). ----
    acc2 = jnp.dot(w2_ref[0], hstack_ref[:, pl.ds(0, n_cols)],
                   preferred_element_type=jnp.float32)
    for k in range(1, _K):
        acc2 += jnp.dot(w2_ref[k], hstack_ref[:, pl.ds(k, n_cols)],
                        preferred_element_type=jnp.float32)
    y = jnp.maximum(acc2 + b2_ref[...], 0.0)

    # Lane-dense output stores: offsets b*S and width L2p are multiples of 128 so these
    # are unmasked full-lane stores; the [L2, L2p) tail is sliced off in the wrapper.
    for b in range(bt):
        o_ref[b] = y[:, b * S:b * S + L2p].astype(o_ref.dtype)


def _vmem_bytes(bt, cin, cout, L, L2p, cin_pad, cout_pad, op_bytes):
    """Rough per-grid-step VMEM working set (double-buffered blocks + scratches)."""
    S = _round_up(L, _LANES)
    n_cols = bt * S + _LANES
    in_blk = 2 * bt * cin * L * 4                 # double-buffered input block (f32)
    out_blk = 2 * bt * cout * L2p * 4             # double-buffered output block (f32)
    scratch = (cin_pad + cout_pad) * n_cols * op_bytes
    weights = 2 * (_K * cout * (cin_pad + cout_pad) * op_bytes + 2 * cout * 4)
    return in_blk + out_blk + scratch + weights


def _pick_batch_block(B, budget_fn):
    # Largest divisor of B that (a) leaves >= 2 grid steps when B >= 2 (so both v7x
    # TensorCores get work), (b) is <= 8, and (c) keeps the VMEM working set in budget.
    cap = min(8, B // 2) if B >= 2 else 1
    best = 1
    for d in range(1, max(cap, 1) + 1):
        if B % d == 0 and budget_fn(d) <= _VMEM_BUDGET:
            best = d
    return best


def doubleconv_35(x_ncl, w1, b1, w2, b2, *, batch_block=None, mxu_dtype=jnp.float32):
    """Fused Conv1d(k=5)+ReLU -> Conv1d(k=5)+ReLU, PyTorch NCL conventions.

    x_ncl: (B, Cin, L) float32
    w1   : (Cout, Cin, 5),  b1: (Cout,)
    w2   : (Cout, Cout, 5), b2: (Cout,)
    returns (B, Cout, L - 8), matching nn.Conv1d(k=5, padding=0) x2 with ReLU x2.
    Set mxu_dtype=jnp.bfloat16 for MXU-bound shapes on v6e/v7x (relax tolerances).
    """
    B, cin, L = x_ncl.shape
    cout = w1.shape[0]
    assert w1.shape == (cout, cin, _K) and w2.shape == (cout, cout, _K)
    assert b1.shape == (cout,) and b2.shape == (cout,)
    L2 = L - 2 * (_K - 1)
    assert L2 > 0, "input length too short for two valid k=5 convolutions"

    op_bytes = jnp.dtype(mxu_dtype).itemsize
    sub = 8 * (4 // op_bytes)          # sublane packing: 8 rows for f32, 16 for bf16
    cin_pad = _round_up(cin, sub)
    cout_pad = _round_up(cout, sub)
    L2p = _round_up(L2, _LANES)        # lane-dense output width (tail sliced below)
    S = _round_up(L, _LANES)           # per-batch lane stride inside the kernel

    budget_fn = lambda d: _vmem_bytes(d, cin, cout, L, L2p, cin_pad, cout_pad, op_bytes)
    bt = batch_block or _pick_batch_block(B, budget_fn)
    assert B % bt == 0
    # TODO(synk): for very long L, add a second "parallel" grid axis tiling L with a
    # (K-1)-element halo to bound per-step VMEM further; unnecessary at these sizes.

    # One-time, tiny weight/bias prep (per-tap matrices; zero-padded channel columns
    # match the zeroed padded rows of the stacked scratches).  No activation copies.
    w1t = jnp.pad(jnp.transpose(w1, (2, 0, 1)),
                  ((0, 0), (0, 0), (0, cin_pad - cin))).astype(mxu_dtype)    # (K,Cout,Cin_pad)
    w2t = jnp.pad(jnp.transpose(w2, (2, 0, 1)),
                  ((0, 0), (0, 0), (0, cout_pad - cout))).astype(mxu_dtype)  # (K,Cout,Cout_pad)
    b1_2d = b1.reshape(cout, 1).astype(jnp.float32)
    b2_2d = b2.reshape(cout, 1).astype(jnp.float32)

    vmem_limit = int(min(48 * 2**20, max(32 * 2**20, 1.25 * budget_fn(bt))))

    out_padded = pl.pallas_call(
        _doubleconv_kernel,
        out_shape=jax.ShapeDtypeStruct((B, cout, L2p), x_ncl.dtype),
        grid_spec=pltpu.PrefetchScalarGridSpec(
            num_scalar_prefetch=0,
            grid=(B // bt,),
            in_specs=[
                pl.BlockSpec((bt, cin, L), lambda i: (i, 0, 0)),
                pl.BlockSpec((_K, cout, cin_pad), lambda i: (0, 0, 0)),
                pl.BlockSpec((cout, 1), lambda i: (0, 0)),
                pl.BlockSpec((_K, cout, cout_pad), lambda i: (0, 0, 0)),
                pl.BlockSpec((cout, 1), lambda i: (0, 0)),
            ],
            out_specs=pl.BlockSpec((bt, cout, L2p), lambda i: (i, 0, 0)),
            scratch_shapes=[
                pltpu.VMEM((cin_pad, bt * S + _LANES), mxu_dtype),
                pltpu.VMEM((cout_pad, bt * S + _LANES), mxu_dtype),
            ],
        ),
        compiler_params=pltpu.CompilerParams(
            dimension_semantics=("parallel",),
            vmem_limit_bytes=vmem_limit),
    )(x_ncl, w1t, b1_2d, w2t, b2_2d)

    return out_padded[:, :, :L2]


def _reference(x_ncl, w1, b1, w2, b2):
    """Pure-JAX reference matching PyTorch Conv1d semantics (valid conv)."""
    def conv1d(x, w, b):
        y = jax.lax.conv_general_dilated(
            x, w, window_strides=(1,), padding="VALID",
            dimension_numbers=("NCH", "OIH", "NCH"),
            precision=jax.lax.Precision.HIGHEST)
        return y + b[None, :, None]
    h = jax.nn.relu(conv1d(x_ncl, w1, b1))
    return jax.nn.relu(conv1d(h, w2, b2))


if __name__ == "__main__":
    key = jax.random.PRNGKey(0)
    B, CH_IN, CH_OUT, L = 2, 4, 8, 16

    kx, kw1, kb1, kw2, kb2 = jax.random.split(key, 5)
    x = jax.random.normal(kx, (B, CH_IN, L), dtype=jnp.float32)
    # Deterministic synthetic parameters (same shapes as nn.Conv1d(k=5) weights).
    w1 = jax.random.normal(kw1, (CH_OUT, CH_IN, _K), dtype=jnp.float32) * 0.2
    b1 = jax.random.normal(kb1, (CH_OUT,), dtype=jnp.float32) * 0.1
    w2 = jax.random.normal(kw2, (CH_OUT, CH_OUT, _K), dtype=jnp.float32) * 0.2
    b2 = jax.random.normal(kb2, (CH_OUT,), dtype=jnp.float32) * 0.1

    out = jax.block_until_ready(doubleconv_35(x, w1, b1, w2, b2))
    ref = jax.block_until_ready(_reference(x, w1, b1, w2, b2))

    assert out.shape == (B, CH_OUT, L - 2 * (_K - 1)), out.shape
    assert jnp.allclose(out, ref, atol=1e-4, rtol=1e-4), (
        "mismatch vs reference, max abs err = "
        + str(float(jnp.max(jnp.abs(out - ref)))))

    print("KERNEL_OK")
</pallas_src>

<mosaic_0001>
module attributes {stable_mosaic.version = 11 : i64} {
  func.func @_doubleconv_kernel(%arg0: i32, %arg1: memref<1x4x16xf32, #tpu.memory_space<vmem>>, %arg2: memref<5x8x8xf32, #tpu.memory_space<vmem>>, %arg3: memref<8x1xf32, #tpu.memory_space<vmem>>, %arg4: memref<5x8x8xf32, #tpu.memory_space<vmem>>, %arg5: memref<8x1xf32, #tpu.memory_space<vmem>>, %arg6: memref<1x8x128xf32, #tpu.memory_space<vmem>>, %arg7: memref<8x256xf32, #tpu.memory_space<vmem>>, %arg8: memref<8x256xf32, #tpu.memory_space<vmem>>) attributes {dimension_semantics = [#tpu.dimension_semantics<parallel>], iteration_bounds = array<i64: 2>, scalar_prefetch = 0 : i64, scratch_operands = 2 : i64, tpu.core_type = #tpu.core_type<tc>, window_params = [{transform_indices = @transform_0, window_bounds = array<i64: 1, 4, 16>}, {pipeline_mode = #tpu.pipeline_mode<synchronous>, transform_indices = @transform_1, window_bounds = array<i64: 5, 8, 8>}, {pipeline_mode = #tpu.pipeline_mode<synchronous>, transform_indices = @transform_2, window_bounds = array<i64: 8, 1>}, {pipeline_mode = #tpu.pipeline_mode<synchronous>, transform_indices = @transform_3, window_bounds = array<i64: 5, 8, 8>}, {pipeline_mode = #tpu.pipeline_mode<synchronous>, transform_indices = @transform_4, window_bounds = array<i64: 8, 1>}, {transform_indices = @transform_5, window_bounds = array<i64: 1, 8, 128>}]} {
    %c0_i32 = arith.constant 0 : i32
    %0 = arith.cmpi eq, %arg0, %c0_i32 : i32
    %1 = arith.extui %0 : i1 to i32
    %c0_i32_0 = arith.constant 0 : i32
    %2 = arith.cmpi ne, %1, %c0_i32_0 : i32
    scf.if %2 {
      %cst_71 = arith.constant 0.000000e+00 : f32
      %68 = vector.broadcast %cst_71 : f32 to vector<4x256xf32>
      %c4_72 = arith.constant 4 : index
      %c0_73 = arith.constant 0 : index
      %69 = vector.load %arg7[%c4_72, %c0_73] : memref<8x256xf32, #tpu.memory_space<vmem>>, vector<4x256xf32>
      tpu.vector_store %arg7[%c4_72, %c0_73], %68 {strides = array<i32>} : memref<8x256xf32, #tpu.memory_space<vmem>>, vector<4x256xf32>,
    } else {
    }
    %c0 = arith.constant 0 : index
    %c0_1 = arith.constant 0 : index
    %c0_2 = arith.constant 0 : index
    %3 = vector.load %arg1[%c0, %c0_1, %c0_2] : memref<1x4x16xf32, #tpu.memory_space<vmem>>, vector<1x4x16xf32>
    %4 = vector.shape_cast %3 : vector<1x4x16xf32> to vector<4x16xf32>
    %c0_3 = arith.constant 0 : index
    %c0_4 = arith.constant 0 : index
    %5 = vector.load %arg7[%c0_3, %c0_4] : memref<8x256xf32, #tpu.memory_space<vmem>>, vector<4x16xf32>
    tpu.vector_store %arg7[%c0_3, %c0_4], %4 {strides = array<i32>} : memref<8x256xf32, #tpu.memory_space<vmem>>, vector<4x16xf32>,
    %c0_5 = arith.constant 0 : index
    %c0_6 = arith.constant 0 : index
    %c0_7 = arith.constant 0 : index
    %6 = vector.load %arg2[%c0_5, %c0_6, %c0_7] : memref<5x8x8xf32, #tpu.memory_space<vmem>>, vector<1x8x8xf32>
    %7 = vector.shape_cast %6 : vector<1x8x8xf32> to vector<8x8xf32>
    %c0_8 = arith.constant 0 : index
    %c0_9 = arith.constant 0 : index
    %8 = vector.load %arg7[%c0_8, %c0_9] : memref<8x256xf32, #tpu.memory_space<vmem>>, vector<8x128xf32>
    %cst = arith.constant dense<0.000000e+00> : vector<8x128xf32>
    %9 = tpu.matmul %7, %8, %cst {dimension_numbers = #tpu.dot_dimension_numbers<[1], [0], [0], [1], [0, 0, 1, 1], [], []>} : vector<8x8xf32>, vector<8x128xf32>, vector<8x128xf32> -> vector<8x128xf32>
    %c1 = arith.constant 1 : index
    %c0_10 = arith.constant 0 : index
    %c0_11 = arith.constant 0 : index
    %10 = vector.load %arg2[%c1, %c0_10, %c0_11] : memref<5x8x8xf32, #tpu.memory_space<vmem>>, vector<1x8x8xf32>
    %11 = vector.shape_cast %10 : vector<1x8x8xf32> to vector<8x8xf32>
    %c0_12 = arith.constant 0 : index
    %c1_13 = arith.constant 1 : index
    %12 = vector.load %arg7[%c0_12, %c1_13] : memref<8x256xf32, #tpu.memory_space<vmem>>, vector<8x128xf32>
    %cst_14 = arith.constant dense<0.000000e+00> : vector<8x128xf32>
    %13 = tpu.matmul %11, %12, %cst_14 {dimension_numbers = #tpu.dot_dimension_numbers<[1], [0], [0], [1], [0, 0, 1, 1], [], []>} : vector<8x8xf32>, vector<8x128xf32>, vector<8x128xf32> -> vector<8x128xf32>
    %14 = arith.addf %9, %13 : vector<8x128xf32>
    %c2 = arith.constant 2 : index
    %c0_15 = arith.constant 0 : index
    %c0_16 = arith.constant 0 : index
    %15 = vector.load %arg2[%c2, %c0_15, %c0_16] : memref<5x8x8xf32, #tpu.memory_space<vmem>>, vector<1x8x8xf32>
    %16 = vector.shape_cast %15 : vector<1x8x8xf32> to vector<8x8xf32>
    %c0_17 = arith.constant 0 : index
    %c2_18 = arith.constant 2 : index
    %17 = vector.load %arg7[%c0_17, %c2_18] : memref<8x256xf32, #tpu.memory_space<vmem>>, vector<8x128xf32>
    %cst_19 = arith.constant dense<0.000000e+00> : vector<8x128xf32>
    %18 = tpu.matmul %16, %17, %cst_19 {dimension_numbers = #tpu.dot_dimension_numbers<[1], [0], [0], [1], [0, 0, 1, 1], [], []>} : vector<8x8xf32>, vector<8x128xf32>, vector<8x128xf32> -> vector<8x128xf32>
    %19 = arith.addf %14, %18 : vector<8x128xf32>
    %c3 = arith.constant 3 : index
    %c0_20 = arith.constant 0 : index
    %c0_21 = arith.constant 0 : index
    %20 = vector.load %arg2[%c3, %c0_20, %c0_21] : memref<5x8x8xf32, #tpu.memory_space<vmem>>, vector<1x8x8xf32>
    %21 = vector.shape_cast %20 : vector<1x8x8xf32> to vector<8x8xf32>
    %c0_22 = arith.constant 0 : index
    %c3_23 = arith.constant 3 : index
    %22 = vector.load %arg7[%c0_22, %c3_23] : memref<8x256xf32, #tpu.memory_space<vmem>>, vector<8x128xf32>
    %cst_24 = arith.constant dense<0.000000e+00> : vector<8x128xf32>
    %23 = tpu.matmul %21, %22, %cst_24 {dimension_numbers = #tpu.dot_dimension_numbers<[1], [0], [0], [1], [0, 0, 1, 1], [], []>} : vector<8x8xf32>, vector<8x128xf32>, vector<8x128xf32> -> vector<8x128xf32>
    %24 = arith.addf %19, %23 : vector<8x128xf32>
    %c4 = arith.constant 4 : index
    %c0_25 = arith.constant 0 : index
    %c0_26 = arith.constant 0 : index
    %25 = vector.load %arg2[%c4, %c0_25, %c0_26] : memref<5x8x8xf32, #tpu.memory_space<vmem>>, vector<1x8x8xf32>
    %26 = vector.shape_cast %25 : vector<1x8x8xf32> to vector<8x8xf32>
    %c0_27 = arith.constant 0 : index
    %c4_28 = arith.constant 4 : index
    %27 = vector.load %arg7[%c0_27, %c4_28] : memref<8x256xf32, #tpu.memory_space<vmem>>, vector<8x128xf32>
    %cst_29 = arith.constant dense<0.000000e+00> : vector<8x128xf32>
    %28 = tpu.matmul %26, %27, %cst_29 {dimension_numbers = #tpu.dot_dimension_numbers<[1], [0], [0], [1], [0, 0, 1, 1], [], []>} : vector<8x8xf32>, vector<8x128xf32>, vector<8x128xf32> -> vector<8x128xf32>
    %29 = arith.addf %24, %28 : vector<8x128xf32>
    %c0_30 = arith.constant 0 : index
    %c0_31 = arith.constant 0 : index
    %30 = vector.load %arg3[%c0_30, %c0_31] : memref<8x1xf32, #tpu.memory_space<vmem>>, vector<8x1xf32>
    %31 = vector.broadcast %30 : vector<8x1xf32> to vector<8x128xf32>
    %32 = arith.addf %29, %31 : vector<8x128xf32>
    %cst_32 = arith.constant 0.000000e+00 : f32
    %33 = vector.broadcast %cst_32 : f32 to vector<8x128xf32>
    %34 = arith.maximumf %32, %33 : vector<8x128xf32>
    %c0_33 = arith.constant 0 : index
    %c0_34 = arith.constant 0 : index
    %35 = vector.load %arg8[%c0_33, %c0_34] : memref<8x256xf32, #tpu.memory_space<vmem>>, vector<8x128xf32>
    tpu.vector_store %arg8[%c0_33, %c0_34], %34 {strides = array<i32>} : memref<8x256xf32, #tpu.memory_space<vmem>>, vector<8x128xf32>,
    %c0_35 = arith.constant 0 : index
    %c0_36 = arith.constant 0 : index
    %c0_37 = arith.constant 0 : index
    %36 = vector.load %arg4[%c0_35, %c0_36, %c0_37] : memref<5x8x8xf32, #tpu.memory_space<vmem>>, vector<1x8x8xf32>
    %37 = vector.shape_cast %36 : vector<1x8x8xf32> to vector<8x8xf32>
    %c0_38 = arith.constant 0 : index
    %c0_39 = arith.constant 0 : index
    %38 = vector.load %arg8[%c0_38, %c0_39] : memref<8x256xf32, #tpu.memory_space<vmem>>, vector<8x128xf32>
    %cst_40 = arith.constant dense<0.000000e+00> : vector<8x128xf32>
    %39 = tpu.matmul %37, %38, %cst_40 {dimension_numbers = #tpu.dot_dimension_numbers<[1], [0], [0], [1], [0, 0, 1, 1], [], []>} : vector<8x8xf32>, vector<8x128xf32>, vector<8x128xf32> -> vector<8x128xf32>
    %c1_41 = arith.constant 1 : index
    %c0_42 = arith.constant 0 : index
    %c0_43 = arith.constant 0 : index
    %40 = vector.load %arg4[%c1_41, %c0_42, %c0_43] : memref<5x8x8xf32, #tpu.memory_space<vmem>>, vector<1x8x8xf32>
    %41 = vector.shape_cast %40 : vector<1x8x8xf32> to vector<8x8xf32>
    %c0_44 = arith.constant 0 : index
    %c1_45 = arith.constant 1 : index
    %42 = vector.load %arg8[%c0_44, %c1_45] : memref<8x256xf32, #tpu.memory_space<vmem>>, vector<8x128xf32>
    %cst_46 = arith.constant dense<0.000000e+00> : vector<8x128xf32>
    %43 = tpu.matmul %41, %42, %cst_46 {dimension_numbers = #tpu.dot_dimension_numbers<[1], [0], [0], [1], [0, 0, 1, 1], [], []>} : vector<8x8xf32>, vector<8x128xf32>, vector<8x128xf32> -> vector<8x128xf32>
    %44 = arith.addf %39, %43 : vector<8x128xf32>
    %c2_47 = arith.constant 2 : index
    %c0_48 = arith.constant 0 : index
    %c0_49 = arith.constant 0 : index
    %45 = vector.load %arg4[%c2_47, %c0_48, %c0_49] : memref<5x8x8xf32, #tpu.memory_space<vmem>>, vector<1x8x8xf32>
    %46 = vector.shape_cast %45 : vector<1x8x8xf32> to vector<8x8xf32>
    %c0_50 = arith.constant 0 : index
    %c2_51 = arith.constant 2 : index
    %47 = vector.load %arg8[%c0_50, %c2_51] : memref<8x256xf32, #tpu.memory_space<vmem>>, vector<8x128xf32>
    %cst_52 = arith.constant dense<0.000000e+00> : vector<8x128xf32>
    %48 = tpu.matmul %46, %47, %cst_52 {dimension_numbers = #tpu.dot_dimension_numbers<[1], [0], [0], [1], [0, 0, 1, 1], [], []>} : vector<8x8xf32>, vector<8x128xf32>, vector<8x128xf32> -> vector<8x128xf32>
    %49 = arith.addf %44, %48 : vector<8x128xf32>
    %c3_53 = arith.constant 3 : index
    %c0_54 = arith.constant 0 : index
    %c0_55 = arith.constant 0 : index
    %50 = vector.load %arg4[%c3_53, %c0_54, %c0_55] : memref<5x8x8xf32, #tpu.memory_space<vmem>>, vector<1x8x8xf32>
    %51 = vector.shape_cast %50 : vector<1x8x8xf32> to vector<8x8xf32>
    %c0_56 = arith.constant 0 : index
    %c3_57 = arith.constant 3 : index
    %52 = vector.load %arg8[%c0_56, %c3_57] : memref<8x256xf32, #tpu.memory_space<vmem>>, vector<8x128xf32>
    %cst_58 = arith.constant dense<0.000000e+00> : vector<8x128xf32>
    %53 = tpu.matmul %51, %52, %cst_58 {dimension_numbers = #tpu.dot_dimension_numbers<[1], [0], [0], [1], [0, 0, 1, 1], [], []>} : vector<8x8xf32>, vector<8x128xf32>, vector<8x128xf32> -> vector<8x128xf32>
    %54 = arith.addf %49, %53 : vector<8x128xf32>
    %c4_59 = arith.constant 4 : index
    %c0_60 = arith.constant 0 : index
    %c0_61 = arith.constant 0 : index
    %55 = vector.load %arg4[%c4_59, %c0_60, %c0_61] : memref<5x8x8xf32, #tpu.memory_space<vmem>>, vector<1x8x8xf32>
    %56 = vector.shape_cast %55 : vector<1x8x8xf32> to vector<8x8xf32>
    %c0_62 = arith.constant 0 : index
    %c4_63 = arith.constant 4 : index
    %57 = vector.load %arg8[%c0_62, %c4_63] : memref<8x256xf32, #tpu.memory_space<vmem>>, vector<8x128xf32>
    %cst_64 = arith.constant dense<0.000000e+00> : vector<8x128xf32>
    %58 = tpu.matmul %56, %57, %cst_64 {dimension_numbers = #tpu.dot_dimension_numbers<[1], [0], [0], [1], [0, 0, 1, 1], [], []>} : vector<8x8xf32>, vector<8x128xf32>, vector<8x128xf32> -> vector<8x128xf32>
    %59 = arith.addf %54, %58 : vector<8x128xf32>
    %c0_65 = arith.constant 0 : index
    %c0_66 = arith.constant 0 : index
    %60 = vector.load %arg5[%c0_65, %c0_66] : memref<8x1xf32, #tpu.memory_space<vmem>>, vector<8x1xf32>
    %61 = vector.broadcast %60 : vector<8x1xf32> to vector<8x128xf32>
    %62 = arith.addf %59, %61 : vector<8x128xf32>
    %cst_67 = arith.constant 0.000000e+00 : f32
    %63 = vector.broadcast %cst_67 : f32 to vector<8x128xf32>
    %64 = arith.maximumf %62, %63 : vector<8x128xf32>
    %c0_68 = arith.constant 0 : index
    %c0_69 = arith.constant 0 : index
    %c0_70 = arith.constant 0 : index
    %65 = vector.load %arg6[%c0_68, %c0_69, %c0_70] : memref<1x8x128xf32, #tpu.memory_space<vmem>>, vector<1x8x128xf32>
    %66 = vector.shape_cast %65 : vector<1x8x128xf32> to vector<8x128xf32>
    %67 = vector.shape_cast %64 : vector<8x128xf32> to vector<1x8x128xf32>
    tpu.vector_store %arg6[%c0_68, %c0_69, %c0_70], %67 {strides = array<i32>} : memref<1x8x128xf32, #tpu.memory_space<vmem>>, vector<1x8x128xf32>,
    return
  }
  func.func @transform_0(%arg0: i32) -> (i32, i32, i32) {
    %c0_i32 = arith.constant 0 : i32
    %c0_i32_0 = arith.constant 0 : i32
    %c0_i32_1 = arith.constant 0 : i32
    return %arg0, %c0_i32, %c0_i32_0 : i32, i32, i32
  }
  func.func @transform_1(%arg0: i32) -> (i32, i32, i32) {
    %c0_i32 = arith.constant 0 : i32
    %c0_i32_0 = arith.constant 0 : i32
    %c0_i32_1 = arith.constant 0 : i32
    %c0_i32_2 = arith.constant 0 : i32
    return %c0_i32, %c0_i32_0, %c0_i32_1 : i32, i32, i32
  }
  func.func @transform_2(%arg0: i32) -> (i32, i32) {
    %c0_i32 = arith.constant 0 : i32
    %c0_i32_0 = arith.constant 0 : i32
    %c0_i32_1 = arith.constant 0 : i32
    return %c0_i32, %c0_i32_0 : i32, i32
  }
  func.func @transform_3(%arg0: i32) -> (i32, i32, i32) {
    %c0_i32 = arith.constant 0 : i32
    %c0_i32_0 = arith.constant 0 : i32
    %c0_i32_1 = arith.constant 0 : i32
    %c0_i32_2 = arith.constant 0 : i32
    return %c0_i32, %c0_i32_0, %c0_i32_1 : i32, i32, i32
  }
  func.func @transform_4(%arg0: i32) -> (i32, i32) {
    %c0_i32 = arith.constant 0 : i32
    %c0_i32_0 = arith.constant 0 : i32
    %c0_i32_1 = arith.constant 0 : i32
    return %c0_i32, %c0_i32_0 : i32, i32
  }
  func.func @transform_5(%arg0: i32) -> (i32, i32, i32) {
    %c0_i32 = arith.constant 0 : i32
    %c0_i32_0 = arith.constant 0 : i32
    %c0_i32_1 = arith.constant 0 : i32
    return %arg0, %c0_i32, %c0_i32_0 : i32, i32, i32
  }
}

</mosaic_0001>

<bundles_post_ra>
// kernel: tpu_custom_call.1
= control target key start
LH: loop header
LB: loop body
LE: loop exit
PB: predicated region body
PF: predicated region fallthrough
CT: control target
= control target key end

     0   :  { %10 = vsyncpa [#allocation5], 0  ;;  %s1782_s0 = inlined_call_operand.vmem [shape: f32[2,4,16], index: 0, kind: input, shape index: {}]   ;;  %s1783_s1 = inlined_call_operand.hbm [shape: f32[5,8,8], index: 1, kind: input, shape index: {}]   ;;  %s1784_s2 = inlined_call_operand.vmem [shape: f32[8,1], index: 2, kind: input, shape index: {}]   ;;  %s1785_s3 = inlined_call_operand.hbm [shape: f32[5,8,8], index: 3, kind: input, shape index: {}]   ;;  %s1786_s4 = inlined_call_operand.vmem [shape: f32[8,1], index: 4, kind: input, shape index: {}]   ;;  %s1787_s5 = inlined_call_operand.hbm [shape: f32[2,8,128], index: 5, kind: output, shape index: {}]  }
   0x1   :  { %11 = vsyncpa [#allocation8], 0 }
   0x2   :  { %12 = vsyncpa [#allocation6], 0 }
   0x3   :  { %14 = vsyncpa [#allocation6 + $0x1], 0  ;;  %s1526_s18 = smov 0   ;;  %s1528_s19 = smov 0  }
   0x4   :  { %s1530_s20 = smov 0   ;;  %s1532_s21 = smov 0  }
   0x5 LB: > { %s1547_s22 = sadd.s32 4294967295, %s1481_s21   ;;  %s1189_s23 = sadd.s32 4294967294, %s1481_s21   ;;  %s1481_s21 = sphi %s1532_s21, %s1806_s21   ;;  %s1477_s20 = sphi %s1530_s20, %s1805_s20   ;;  %s1473_s19 = sphi %s1528_s19, %s1804_s19   ;;  %s1469_s18 = sphi %s1526_s18, %s1803_s18  }
   0x6   : > { %s1551_s24 = sadd.s32 1, %s1481_s21   ;;  %s137_s25 = sadd.s32 1, %s1477_s20 }
   0x7   : > { %s134_s26 = ssub.s32 %s1481_s21, %s1551_s24  ;;  %p147_p0 = scmp.ne.s32.totalorder %s1477_s20, %s1473_s19 }
   0x8   : > { %p135_p1 = scmp.eq.s32.totalorder %s134_s26, 0  ;;  %p148_p2 = scmp.eq.s32.totalorder %s1547_s22, 1 }
   0x9   : > { %p153_p3 = scmp.ne.s32.totalorder %s1473_s19, %s1469_s18  ;;  %p154_p4 = scmp.eq.s32.totalorder %s1189_s23, 1 }
   0xa   : > { %s1562_s27 = scalar_select %p135_p1, %s1477_s20, %s137_s25  }
   0xb   : > { %p1564_p5 = por %p148_p2, %p147_p0  ;;  %p1568_p6 = por %p154_p4, %p153_p3 }
   0xc   : > { %p1190_p7 = scmp.ge.s32.totalorder %s1481_s21, 1  ;;  %p161_p8 = scmp.lt.s32.totalorder %s1481_s21, 3 }
   0xd   : > { %s1791_s28 = scalar_select %p1564_p5, 1, 0 }
   0xe   : > { %s1792_s29 = scalar_select %p1568_p6, 1, 0 }
   0xf   : > { %p1788_p10 = scmp.eq.s32.totalorder %s1547_s22, 0  ;;  %p1576_p11 = pnand %p1190_p7, %p161_p8 }
  0x10   : > { %s1483_s6 = smov [#allocation4]   ;;  %s1484_s9 = smov [#allocation7]  }
  0x11   : > { %s1793_s30 = scalar_select %p1576_p11, 1, 0 }
  0x12   : > { %s173_s7 = sshll.u32 %s1483_s6, 4  ;;  %p1294_p12 = pneg %p1576_p11  ;;  %s174_s7 = int_to_ptr.vmem [resolvable:$true] %s173_s7 }
  0x13   : > { %s189_s10 = sshll.u32 %s1484_s9, 4  ;;  %s1355_s13 = scalar_lea.hbm %s1783_s1, 640  ;;  %s1588_s10 = int_to_ptr.vmem [resolvable:$true] %s189_s10 }
  0x14   : > { %p1584_p13 = pnand %p1788_p10, %p1294_p12  ;;  %p1356_p0 = scmp.ne.s32.totalorder %s1783_s1, %s1355_s13 }
  0x15   : > { %p1362_p4 = scmp.lt.u32.totalorder %s1355_s13, %s1783_s1 }
  0x16   : > { %p1357_p1 = pneg %p1584_p13 }
  0x18   : > { %p1358_p2 = pnand %p1357_p1, %p1356_p0 }
  0x1a   : > { %p1359_p3 = pneg %p1358_p2 }
  0x1c   : > { %p1364_p7 = pnand %p1362_p4, %p1359_p3 }
  0x1e   : > { %1367 = shalt.err (!%p1364_p7)
}
  0x1f   : > { %s1368_s23 = scalar_lea.vmem %s174_s7, 640  ;;  %p1376_p10 = scmp.lt.s32.totalorder %s174_s7, %s174_s7 }
  0x20   : > { %p1369_p8 = scmp.ne.s32.totalorder %s174_s7, %s1368_s23  ;;  %p1377_p6 = scmp.lt.s32.totalorder %s1368_s23, %s1368_s23 }
  0x22   : > { %p1371_p12 = pnand %p1369_p8, %p1357_p1  ;;  %p1378_p5 = por %p1377_p6, %p1376_p10 }
  0x24   : > { %p1372_p9 = pneg %p1371_p12 }
  0x26   : > { %p1379_p11 = pnand %p1378_p5, %p1372_p9 }
  0x28   : > { %1382 = shalt.err (!%p1379_p11)
}
  0x29   : > { %s1485_s25 = smov 128   ;;  %s1486_s26 = smov 8  }
  0x2a   : > { %1297 = dma.hbm_to_vmem [thread:$0]  (!%p1584_p13), %s1783_s1, 640, %s174_s7, [#allocation5], %s1485_s25, %s1485_s25, %s1486_s26  }
  0x2b   : > { %s1383_s13 = scalar_lea.hbm %s1785_s3, 640 }
  0x2c   : > { %p1384_p0 = scmp.ne.s32.totalorder %s1785_s3, %s1383_s13  ;;  %p1390_p9 = scmp.lt.u32.totalorder %s1383_s13, %s1785_s3 }
  0x2e   : > { %p1386_p5 = pnand %p1384_p0, %p1357_p1 }
  0x30   : > { %p1387_p6 = pneg %p1386_p5 }
  0x32   : > { %p1392_p10 = pnand %p1390_p9, %p1387_p6 }
  0x34   : > { %1395 = shalt.err (!%p1392_p10)
}
  0x35   : > { %s1396_s7 = scalar_lea.vmem %s1588_s10, 640  ;;  %p1404_p4 = scmp.lt.s32.totalorder %s1588_s10, %s1588_s10 }
  0x36   : > { %p1397_p11 = scmp.ne.s32.totalorder %s1588_s10, %s1396_s7  ;;  %p1405_p7 = scmp.lt.s32.totalorder %s1396_s7, %s1396_s7 }
  0x38   : > { %p1399_p2 = pnand %p1397_p11, %p1357_p1  ;;  %p1406_p8 = por %p1405_p7, %p1404_p4 }
  0x3a   : > { %p1400_p3 = pneg %p1399_p2 }
  0x3c   : > { %p1407_p12 = pnand %p1406_p8, %p1400_p3 }
  0x3e   : > { %1410 = shalt.err (!%p1407_p12)
}
  0x3f   : > { %1300 = dma.hbm_to_vmem [thread:$0]  (!%p1584_p13), %s1785_s3, 640, %s1588_s10, [#allocation8], %s1485_s25, %s1485_s25, %s1486_s26  }
  0x40   : > { %p1795_p0 = scmp.ne.s32.totalorder %s1793_s30, 0 }
  0x41   : > { %p1796_p5 = scmp.eq.s32.totalorder (!%p1795_p0), %s1547_s22, 0 }
  0x42   : > { %215 = sbr.rel (%p1795_p0) target bundleno = 797 (0x31d), region = 40 }
  0x49   : > { %1456 = dma.done.wait (%p1796_p5), [#allocation5], 640   ;;  %p1797_p1 = pmov %p1796_p5 }
  0x4b   : > { %1458 = vsyncadd (%p1797_p1), [#allocation5], 4294966656  ;;  %p1798_p6 = pmov %p1797_p1 }
  0x4c   : > { %p1799_p9 = pmov %p1797_p1 }
  0x4d   : > { %1460 = dma.done.wait (%p1798_p6), [#allocation8], 640  }
  0x4e   : > { %1462 = vsyncadd (%p1799_p9), [#allocation8], 4294966656  ;;  %s243_s8 = sand.u32 1, %s1473_s19   ;;  %p246_p13 = scmp.lt.s32.totalorder %s1547_s22, 1 }
  0x4f   : > { %s1651_s30 = sshll.u32 %s243_s8, 3  ;;  %p1800_p10 = scmp.ne.s32.totalorder %s1547_s22, 0 }
  0x50   : > { %s247_s10 = scalar_select %p246_p13, %s1547_s22, 1 }
  0x51   : > { %s245_s12 = scalar_lea.vmem [#allocation9], %s1651_s30  ;;  %253 = sbr.rel (%p1800_p10) target bundleno = 88 (0x58), region = 52  ;;  %v1487_v0 = vmov (!%p1800_p10), 0.0  }
  0x52   : > { %s1198_s25 = sshll.u32 %s247_s10, 2  ;;  %254 = vst [vmem:[#allocation2] sm:$0xf0] (!%p1800_p10), %v1487_v0  ;;  %255 = vst [vmem:[#allocation2 + $0x8] sm:$0xf0] (!%p1800_p10), %v1487_v0 }
  0x53   : > { %s249_s11 = scalar_lea.vmem %s1782_s0, %s1198_s25 }
  0x58 PF: > { %v256_v2 = vld [vmem:[%s249_s11] sm:$0xf]  ;;  %vm257_vm0 = vcmask 125952   ;;  %s1488_s13 = smov 126   ;;  %s1489_s14 = smov 127   ;;  %v1490_v3 = vmov 0.0  }
  0x59   : > { %v264_v1 = vld [vmem:[#allocation2 + $0x8] sm:$0xff]  ;;  %258 = vst.msk [vmem:[#allocation2] sm:$0xf] %vm257_vm0, %v256_v2  ;;  %1234 = vmatprep.subr.mxu0 %v1490_v3  ;;  %1239 = vmatprep.subr.mxu1 %v1490_v3  ;;  %vm1491_vm1 = vmmov 0   ;;  %s1492_s15 = smov 125   ;;  %v1493_v4 = vmov 0  }
  0x5a   : > { %425 = vrot.lane.b32.xlu1 %v264_v1, %s1488_s13  ;;  %269 = vrot.lane.b32.xlu0 %v264_v1, %s1489_s14  ;;  %vm274_vm2 = vcmask 64512   ;;  %v259_v6 = vld [vmem:[#allocation4] sm:$0xff]  ;;  %s1494_s16 = smov 124   ;;  %vm271_vm3 = vcmask 1039360   ;;  %vm427_vm4 = vcmask 1031168   ;;  %v262_v13 = vld [vmem:[#allocation4 + $0x8] sm:$0xff] }
  0x5b   : > { %1236 = vmatprep.mubr.msk.f32.mxu0 %vm1491_vm1, %v1490_v3  ;;  %1241 = vmatprep.mubr.msk.f32.mxu1 %vm1491_vm1, %v1490_v3  ;;  %v670_v7 = vld [vmem:[%s1784_s2] sm:$0xff]  ;;  %vm510_vm5 = vcmask 1022976   ;;  %v422_v17 = vld [vmem:[#allocation4 + $0x10] sm:$0xff]  ;;  %v505_v18 = vld [vmem:[#allocation4 + $0x18] sm:$0xff]  ;;  %vm593_vm6 = vcmask 1014784   ;;  %s1211_s10 = sshll.u32 %s1547_s22, 7 }
  0x5c   : > { %1354 = vset.pattern.permute.xlu0 %v1493_v4  ;;  %v588_v22 = vld [vmem:[#allocation4 + $0x20] sm:$0xff]  ;;  %v684_v24 = vld [vmem:[#allocation3 + $0x8] sm:$0xff]  ;;  %v679_v42 = vld [vmem:[#allocation7] sm:$0xff]  ;;  %s1108_s25 = sshll.u32 %s245_s12, 4  ;;  %s1736_s11 = scalar_lea.hbm %s1787_s5, %s1211_s10  ;;  %s1738_s25 = int_to_ptr.vmem [resolvable:$true] %s1108_s25 }
  0x5d   : > { %v1085_v43 = vld [vmem:[%s1786_s4] sm:$0xff]  ;;  %v682_v48 = vld [vmem:[#allocation7 + $0x8] sm:$0xff]  ;;  %v840_v53 = vld [vmem:[#allocation7 + $0x10] sm:$0xff]  ;;  %p1801_p2 = scmp.ne.s32.totalorder %s1791_s28, 0  ;;  %s1495_s22 = smov [#allocation9]  }
  0x5e   : > { %508 = vrot.lane.b32.xlu1 %v264_v1, %s1492_s15  ;;  %v922_v54 = vld [vmem:[#allocation7 + $0x18] sm:$0xff]  ;;  %v1004_v58 = vld [vmem:[#allocation7 + $0x20] sm:$0xff] }
  0x60   : > { %v263_v5 = vld [vmem:[#allocation2] sm:$0xff] }
  0x61   : > { %267 = vrot.lane.b32.xlu0 %v263_v5, %s1489_s14  ;;  %1240 = vmatpush3.msra.mxu1 %v263_v5 }
  0x62   : > { %423 = vrot.lane.b32.xlu1 %v263_v5, %s1488_s13  ;;  %1242 = vmatmul.mubr.msk.f32.vlgmr.msra.gmra.mrb[0].mxu1 %vm274_vm2, %v259_v6 }
  0x63   : > { %1249 = vmatprep.subr.mxu1 %v1490_v3  ;;  %1251 = vmatprep.mubr.msk.f32.mxu1 %vm1491_vm1, %v1490_v3 }
  0x65   : > { %506 = vrot.lane.b32.xlu0 %v263_v5, %s1492_s15 }
  0x66   : > { %591 = vrot.lane.b32.xlu1 %v264_v1, %s1494_s16 }
  0x69   : > { %589 = vrot.lane.b32.xlu0 %v263_v5, %s1494_s16 }
  0x6a   : > { %689 = vrot.lane.b32.xlu1 %v684_v24, %s1489_s14 }
  0x6d   : > { %673 = vperm.xlu0 %1354, %v670_v7  }
  0x6e   : > { %843 = vrot.lane.b32.xlu1 %v684_v24, %s1488_s13 }
  0xcc   : > { %v426_v8 = vpop.permute.xlu1 %425  ;;  %v270_v9 = vpop.permute.xlu0 %269 }
  0xd0   : > { %v509_v10 = vpop.permute.xlu1 %508 }
  0xd3   : > { %v268_v12 = vpop.permute.xlu0 %267 }
  0xd4   : > { %v424_v11 = vpop.permute.xlu1 %423  ;;  %v272_v14 = vsel %vm271_vm3, %v268_v12, %v270_v9 }
  0xd5   : > { %1235 = vmatpush3.msra.mxu0 %v272_v14  ;;  %v428_v15 = vsel %vm427_vm4, %v424_v11, %v426_v8 }
  0xd6   : > { %1237 = vmatmul.mubr.msk.f32.vlgmr.msra.gmra.mrb[0].mxu0 %vm274_vm2, %v262_v13  ;;  %1244 = vmatprep.subr.mxu0 %v1490_v3 }
  0xd7   : > { %1245 = vmatpush3.msra.mxu0 %v428_v15  ;;  %v507_v16 = vpop.permute.xlu0 %506  ;;  %1246 = vmatprep.mubr.msk.f32.mxu0 %vm1491_vm1, %v1490_v3 }
  0xd8   : > { %v511_v19 = vsel %vm510_vm5, %v507_v16, %v509_v10  ;;  %1254 = vmatprep.subr.mxu0 %v1490_v3  ;;  %v592_v20 = vpop.permute.xlu1 %591 }
  0xd9   : > { %1250 = vmatpush3.msra.mxu1 %v511_v19 }
  0xda   : > { %1247 = vmatmul.mubr.msk.f32.vlgmr.msra.gmra.mrb[2].mxu0 %vm274_vm2, %v422_v17  ;;  %1252 = vmatmul.mubr.msk.f32.vlgmr.msra.gmra.mrb[2].mxu1 %vm274_vm2, %v505_v18 }
  0xdb   : > { %v590_v21 = vpop.permute.xlu0 %589  ;;  %1256 = vmatprep.mubr.msk.f32.mxu0 %vm1491_vm1, %v1490_v3  ;;  %1259 = vmatprep.subr.mxu1 %v1490_v3 }
  0xdc   : > { %v594_v23 = vsel %vm593_vm6, %v590_v21, %v592_v20  ;;  %1261 = vmatprep.mubr.msk.f32.mxu1 %vm1491_vm1, %v1490_v3  ;;  %v690_v44 = vpop.permute.xlu1 %689 }
  0xdd   : > { %1255 = vmatpush3.msra.mxu0 %v594_v23 }
  0xde   : > { %1257 = vmatmul.mubr.msk.f32.vlgmr.msra.gmra.mrb[4].mxu0 %vm274_vm2, %v588_v22  ;;  %1264 = vmatprep.subr.mxu0 %v1490_v3 }
  0xdf   : > { %1266 = vmatprep.mubr.msk.f32.mxu0 %vm1491_vm1, %v1490_v3 }
  0xe0   : > { %v844_v45 = vpop.permute.xlu1 %843 }
  0xec   : > { %v674_v37 = vpop.permute.xlu0 %673 }
 0x135   : > { %v417_v25 = vpop.f32.mrb[0].mxu1 }
 0x136   : > { %v1243_v26 = vpop.f32.mrb[1].mxu1 }
 0x1a9   : > { %v344_v27 = vpop.f32.mrb[0].mxu0 }
 0x1aa   : > { %v418_v28 = vadd.f32 %v417_v25, %v344_v27  ;;  %v1238_v29 = vpop.f32.mrb[1].mxu0 }
 0x1ad   : > { %v499_v30 = vpop.f32.mrb[2].mxu0  ;;  %v582_v31 = vpop.f32.mrb[2].mxu1 }
 0x1ae   : > { %v503_v32 = vadd.f32 %v499_v30, %v418_v28  ;;  %v1248_v33 = vpop.f32.mrb[3].mxu0  ;;  %v1253_v34 = vpop.f32.mrb[3].mxu1 }
 0x1b0   : > { %v586_v35 = vadd.f32 %v582_v31, %v503_v32 }
 0x1b1   : > { %v665_v36 = vpop.f32.mrb[4].mxu0 }
 0x1b2   : > { %v669_v38 = vadd.f32 %v665_v36, %v586_v35  ;;  %v1258_v39 = vpop.f32.mrb[5].mxu0 }
 0x1b4   : > { %v676_v40 = vadd.f32 %v674_v37, %v669_v38 }
 0x1b6   : > { %v677_v41 = vmax.f32 %v676_v40, 0.0 }
 0x1b8   : > { %841 = vrot.lane.b32.xlu0 %v677_v41, %s1488_s13  ;;  %687 = vrot.lane.b32.xlu1 %v677_v41, %s1489_s14  ;;  %s1095_s13 = scalar_lea.sflag [#allocation6], %s243_s8  ;;  %s1411_s14 = scalar_lea.vmem %s1738_s25, 128 }
 0x1b9   : > { %1265 = vmatpush3.msra.mxu0 %v677_v41  ;;  %p1412_p11 = scmp.ne.s32.totalorder %s1738_s25, %s1411_s14 }
 0x1ba   : > { %1267 = vmatmul.mubr.msk.f32.vlgmr.msra.gmra.mrb[6].mxu0 %vm274_vm2, %v679_v42  ;;  %1274 = vmatprep.subr.mxu0 %v1490_v3 }
 0x1bb   : > { %1276 = vmatprep.mubr.msk.f32.mxu0 %vm1491_vm1, %v1490_v3  ;;  %p1413_p3 = pnand %p1412_p11, %p1801_p2 }
 0x1bc   : > { %923 = vrot.lane.b32.xlu0 %v677_v41, %s1492_s15  ;;  %925 = vrot.lane.b32.xlu1 %v684_v24, %s1492_s15  ;;  %s1415_s15 = sshll.u32 %s1495_s22, 4  ;;  %s1416_s15 = int_to_ptr.vmem [resolvable:$false] %s1415_s15 }
 0x1bd   : > { %p1414_p4 = pneg %p1413_p3  ;;  %p1418_p7 = scmp.lt.s32.totalorder %s1738_s25, %s1416_s15 }
 0x1c0   : > { %1005 = vrot.lane.b32.xlu0 %v677_v41, %s1494_s16  ;;  %1007 = vrot.lane.b32.xlu1 %v684_v24, %s1494_s16  ;;  %s1417_s16 = scalar_lea.vmem %s1416_s15, 256 }
 0x1c1   : > { %p1419_p8 = scmp.lt.s32.totalorder %s1417_s16, %s1411_s14 }
 0x1c3   : > { %p1420_p12 = por %p1419_p8, %p1418_p7 }
 0x1c4   : > { %1088 = vperm.xlu0 %1354, %v1085_v43  }
 0x1c5   : > { %p1421_p0 = pnand %p1420_p12, %p1414_p4 }
 0x22a   : > { %v842_v46 = vpop.permute.xlu0 %841  ;;  %v688_v47 = vpop.permute.xlu1 %687 }
 0x22b   : > { %v691_v49 = vsel %vm271_vm3, %v688_v47, %v690_v44  ;;  %v845_v50 = vsel %vm427_vm4, %v842_v46, %v844_v45 }
 0x22c   : > { %1260 = vmatpush3.msra.mxu1 %v691_v49 }
 0x22d   : > { %1262 = vmatmul.mubr.msk.f32.vlgmr.msra.gmra.mrb[4].mxu1 %vm274_vm2, %v682_v48  ;;  %1269 = vmatprep.subr.mxu1 %v1490_v3 }
 0x22e   : > { %v924_v51 = vpop.permute.xlu0 %923  ;;  %1270 = vmatpush3.msra.mxu1 %v845_v50  ;;  %v926_v52 = vpop.permute.xlu1 %925  ;;  %1271 = vmatprep.mubr.msk.f32.mxu1 %vm1491_vm1, %v1490_v3 }
 0x22f   : > { %v927_v55 = vsel %vm510_vm5, %v924_v51, %v926_v52  ;;  %1279 = vmatprep.subr.mxu1 %v1490_v3 }
 0x230   : > { %1275 = vmatpush3.msra.mxu0 %v927_v55 }
 0x231   : > { %1272 = vmatmul.mubr.msk.f32.vlgmr.msra.gmra.mrb[6].mxu1 %vm274_vm2, %v840_v53  ;;  %1277 = vmatmul.mubr.msk.f32.vlgmr.msra.gmra.mrb[8].mxu0 %vm274_vm2, %v922_v54 }
 0x232   : > { %v1006_v56 = vpop.permute.xlu0 %1005  ;;  %v1008_v57 = vpop.permute.xlu1 %1007  ;;  %1281 = vmatprep.mubr.msk.f32.mxu1 %vm1491_vm1, %v1490_v3 }
 0x233   : > { %v1009_v59 = vsel %vm593_vm6, %v1006_v56, %v1008_v57 }
 0x234   : > { %1280 = vmatpush3.msra.mxu1 %v1009_v59 }
 0x235   : > { %1282 = vmatmul.mubr.msk.f32.vlgmr.msra.gmra.mrb[8].mxu1 %vm274_vm2, %v1004_v58 }
 0x243   : > { %v1089_v10 = vpop.permute.xlu0 %1088 }
 0x28d   : > { %v835_v60 = vpop.f32.mrb[6].mxu0 }
 0x28e   : > { %v1268_v61 = vpop.f32.mrb[7].mxu0 }
 0x300   : > { %v762_v62 = vpop.f32.mrb[4].mxu1 }
 0x301   : > { %v836_v63 = vadd.f32 %v835_v60, %v762_v62  ;;  %v1263_v0 = vpop.f32.mrb[5].mxu1 }
 0x304   : > { %v916_v1 = vpop.f32.mrb[6].mxu1  ;;  %v998_v2 = vpop.f32.mrb[8].mxu0 }
 0x305   : > { %v920_v4 = vadd.f32 %v916_v1, %v836_v63  ;;  %v1273_v5 = vpop.f32.mrb[7].mxu1  ;;  %v1278_v3 = vpop.f32.mrb[9].mxu0 }
 0x307   : > { %v1002_v6 = vadd.f32 %v998_v2, %v920_v4 }
 0x308   : > { %v1080_v7 = vpop.f32.mrb[8].mxu1 }
 0x309   : > { %v1084_v8 = vadd.f32 %v1080_v7, %v1002_v6  ;;  %v1283_v9 = vpop.f32.mrb[9].mxu1 }
 0x30b   : > { %v1091_v11 = vadd.f32 %v1089_v10, %v1084_v8 }
 0x30d   : > { %v1092_v12 = vmax.f32 %v1091_v11, 0.0 }
 0x30f   : > { %1093 = vst [vmem:[%s245_s12] sm:$0xff] %v1092_v12 }
 0x310   : > { %1424 = shalt.err (!%p1421_p0)
}
 0x311   : > { %s1425_s8 = scalar_lea.hbm %s1736_s11, 128  ;;  %s1429_s17 = scalar_lea.hbm %s1787_s5, 256 }
 0x312   : > { %p1426_p5 = scmp.ne.s32.totalorder %s1736_s11, %s1425_s8  ;;  %p1430_p9 = scmp.lt.u32.totalorder %s1736_s11, %s1787_s5 }
 0x313   : > { %p1431_p13 = scmp.lt.u32.totalorder %s1429_s17, %s1425_s8  ;;  %p1433_p11 = scmp.lt.u32.totalorder %s1425_s8, %s1736_s11 }
 0x314   : > { %p1427_p1 = pnand %p1426_p5, %p1801_p2 }
 0x315   : > { %p1432_p10 = por %p1431_p13, %p1430_p9 }
 0x316   : > { %p1428_p6 = pneg %p1427_p1 }
 0x317   : > { %p1434_p3 = por %p1433_p11, %p1432_p10 }
 0x319   : > { %p1435_p4 = pnand %p1434_p3, %p1428_p6 }
 0x31b   : > { %1438 = shalt.err (!%p1435_p4)
}
 0x31c   : > { %1292 = dma.vmem_to_hbm [thread:$0]  (%p1801_p2), %s1738_s25, 128, %s1736_s11, %s1095_s13  }
 0x31d PF: > { %p1309_p7 = scmp.ge.s32.totalorder %s1481_s21, 2  ;;  %s1120_s6 = sand.u32 1, %s1469_s18  }
 0x31e   : > { %p1802_p8 = scmp.ne.s32.totalorder %s1792_s29, 0  ;;  %s1121_s10 = scalar_lea.sflag [#allocation6], %s1120_s6 }
 0x320   : > { %p1302_p12 = pnand %p1309_p7, %p1802_p8 }
 0x322   : > { %1464 = dma.done.wait (!%p1302_p12), %s1121_s10, 128  }
 0x323   : > { %1466 = vsyncadd (!%p1302_p12), %s1121_s10, 4294967168  ;;  %p17_p0 = scmp.ge.s32.totalorder %s1551_s24, 4   ;;  %s1803_s18 = smov %s1473_s19 }
 0x324   : > { %s1804_s19 = smov %s1477_s20  ;;  %s1805_s20 = smov %s1562_s27 }
 0x325   : > { %s1806_s21 = smov %s1551_s24  ;;  %19 = sbr.rel (!%p17_p0) target bundleno = 5 (0x5), region = 96 }
 0x32c   :  { %1126 = vsyncpa [#allocation5], 1 }
 0x32d   :  { %1128 = vsyncpa [#allocation5 + $0x1], 1 }
 0x32e   :  { %1129 = vsyncpa [#allocation8], 1 }
 0x32f   :  { %1130 = vsyncpa [#allocation6], 1 }
 0x330   :  { %1132 = vsyncpa [#allocation6 + $0x1], 1 }

</bundles_post_ra>
